<compile_context>
chip_gen: v7x
topology: tpu7x:2x2x1
jax: 0.10.0
libtpu: 0.0.40
codegen_flags: <defaults>
</compile_context>

<pallas_src>
import jax
import jax.numpy as jnp
from jax.experimental import pallas as pl
from jax.experimental.pallas import tpu as pltpu


def _critic_kernel(xa_ref, w1_ref, b1_ref, w2_ref, b2_ref, w3_ref, b3_ref, o_ref):
    # Layer 1 (fused concat done on host): bf16 operands, f32 MXU accumulation.
    h1 = jnp.dot(xa_ref[...].astype(w1_ref.dtype), w1_ref[...],
                 preferred_element_type=jnp.float32)
    h1 = jnp.maximum(h1 + b1_ref[...], 0.0)

    # Layer 2: [tb, 256] @ [256, 256], bf16 in / f32 acc, bias + ReLU in f32.
    h2 = jnp.dot(h1.astype(w2_ref.dtype), w2_ref[...],
                 preferred_element_type=jnp.float32)
    h2 = jnp.maximum(h2 + b2_ref[...], 0.0)

    # Layer 3 (output width 1): VPU multiply + lane reduction against the
    # [1, 256] w3 row (avoids a >99%-padded MXU tile); b3 is an SMEM scalar.
    q = jnp.sum(h2 * w3_ref[...], axis=-1) + b3_ref[0]        # [tb] f32
    # Store lane-dense: per-tile result laid out as a (1, tb) row.
    o_ref[...] = q[None, :].astype(o_ref.dtype)


def _round_up(v, m):
    return ((v + m - 1) // m) * m


def _choose_tile(batch, max_tb):
    """Returns (tile, padded_batch). Tile is 128-aligned whenever >1 tile so
    lane-dense (1, tb) output blocks are legal."""
    bp8 = _round_up(max(batch, 1), 8)
    if bp8 <= 128:
        return bp8, bp8                                   # single tile
    tb = min(max_tb, _round_up((bp8 + 1) // 2, 128))      # aim for >= 2 steps (v7x)
    bp = _round_up(bp8, tb)
    return tb, bp


def critic_forward(x, a, params, *, max_tb=1024):
    """x: [B, obs_n], a: [B, act_n] -> q: [B, 1]  (== torch.cat([x, a], 1) path)."""
    w1, b1, w2, b2, w3_row, b3 = params
    B, obs_n = x.shape
    act_n = a.shape[1]
    in_n = obs_n + act_n
    H = w2.shape[0]

    tb, bp = _choose_tile(B, max_tb)
    nb = bp // tb

    xa = jnp.concatenate([x, a], axis=1)     # host concat is ~free (96 B/row)
    if bp != B:
        xa = jnp.pad(xa, ((0, bp - B), (0, 0)))

    def resident(shape):
        # Constant block index -> loaded once, stays VMEM-resident across steps.
        return pl.BlockSpec(shape, lambda i: (0, 0))

    flops = 2 * bp * (in_n * H + H * H + H)
    bytes_accessed = (
        (w1.size + w2.size) * 2                              # bf16 weights
        + (b1.size + b2.size + w3_row.size + b3.size) * 4    # f32 small params
        + (xa.size + bp) * 4                                 # activations + q
    )

    q_row = pl.pallas_call(
        _critic_kernel,
        out_shape=jax.ShapeDtypeStruct((1, bp), jnp.float32),
        grid=(nb,),
        in_specs=[
            pl.BlockSpec((tb, in_n), lambda i: (i, 0)),        # [x|a] tile
            resident((in_n, H)),                               # W1 (bf16)
            resident((1, H)),                                  # b1 (f32)
            resident((H, H)),                                  # W2 (bf16)
            resident((1, H)),                                  # b2 (f32)
            resident((1, H)),                                  # w3 row (f32)
            pl.BlockSpec(memory_space=pltpu.MemorySpace.SMEM),  # b3 scalar
        ],
        out_specs=pl.BlockSpec((1, tb), lambda i: (0, i)),      # lane-dense out
        compiler_params=pltpu.CompilerParams(
            dimension_semantics=("parallel",)),
        cost_estimate=pl.CostEstimate(
            flops=flops, transcendentals=0, bytes_accessed=bytes_accessed),
    )(xa, w1, b1, w2, b2, w3_row, b3)

    return q_row[0, :B][:, None]


def init_params(key, obs_n, act_n, hidden=256):
    """Mimics torch.nn.Linear default init U(-1/sqrt(fan_in), +bound).
    Big weights stored bf16 (MXU operands only); biases / w3 row stay f32."""
    in_n = obs_n + act_n
    ks = jax.random.split(key, 6)

    def lin(kw, kb, fan_in, fan_out):
        bound = 1.0 / (fan_in ** 0.5)
        w = jax.random.uniform(kw, (fan_in, fan_out), jnp.float32, -bound, bound)
        b = jax.random.uniform(kb, (1, fan_out), jnp.float32, -bound, bound)
        return w, b

    w1, b1 = lin(ks[0], ks[1], in_n, hidden)
    w2, b2 = lin(ks[2], ks[3], hidden, hidden)
    w3, b3 = lin(ks[4], ks[5], hidden, 1)

    return (w1.astype(jnp.bfloat16), b1,
            w2.astype(jnp.bfloat16), b2,
            w3.T,                         # [1, hidden] f32, used on the VPU
            b3.reshape((1,)))             # scalar for SMEM


if __name__ == "__main__":
    key = jax.random.PRNGKey(0)
    k_x, k_a, k_x2, k_a2, k_p = jax.random.split(key, 5)

    obs_n, act_n = 16, 8                  # in_n = obs_n + act_n = 24
    params = init_params(k_p, obs_n, act_n)
    w1, b1, w2, b2, w3_row, b3 = params

    def ref_bf16(x, a):
        # Reference replicating the kernel's bf16-operand / f32-accumulate path.
        xa = jnp.concatenate([x, a], axis=1).astype(jnp.bfloat16).astype(jnp.float32)
        h1 = jnp.maximum(xa @ w1.astype(jnp.float32) + b1, 0.0)
        h1 = h1.astype(jnp.bfloat16).astype(jnp.float32)
        h2 = jnp.maximum(h1 @ w2.astype(jnp.float32) + b2, 0.0)
        return jnp.sum(h2 * w3_row, axis=-1, keepdims=True) + b3[0]

    def ref_f32(x, a):
        # Same weights, but no intermediate bf16 rounding of activations
        # (checks the kernel against plain f32 forward semantics).
        xa = jnp.concatenate([x, a], axis=1)
        h1 = jnp.maximum(xa @ w1.astype(jnp.float32) + b1, 0.0)
        h2 = jnp.maximum(h1 @ w2.astype(jnp.float32) + b2, 0.0)
        return jnp.sum(h2 * w3_row, axis=-1, keepdims=True) + b3[0]

    # B=8 exercises the single-tile path; B=160 exercises the multi-tile
    # (nb=2, tb=128) lane-dense path with batch padding.
    for (B, kx, ka) in [(8, k_x, k_a), (160, k_x2, k_a2)]:
        x = jax.random.normal(kx, (B, obs_n), jnp.float32)
        a = jax.random.normal(ka, (B, act_n), jnp.float32)
        q = jax.block_until_ready(critic_forward(x, a, params))
        assert q.shape == (B, 1)
        r16 = ref_bf16(x, a)
        r32 = ref_f32(x, a)
        assert jnp.allclose(q, r16, atol=1e-2, rtol=1e-2), (
            "bf16-path mismatch", float(jnp.max(jnp.abs(q - r16))))
        assert jnp.allclose(q, r32, atol=5e-2, rtol=5e-2), (
            "f32 mismatch", float(jnp.max(jnp.abs(q - r32))))

    print("KERNEL_OK")
</pallas_src>

<mosaic_0001>
module attributes {stable_mosaic.version = 11 : i64} {
  func.func @_critic_kernel(%arg0: i32, %arg1: memref<8x24xf32, #tpu.memory_space<vmem>>, %arg2: memref<24x256xbf16, #tpu.memory_space<vmem>>, %arg3: memref<1x256xf32, #tpu.memory_space<vmem>>, %arg4: memref<256x256xbf16, #tpu.memory_space<vmem>>, %arg5: memref<1x256xf32, #tpu.memory_space<vmem>>, %arg6: memref<1x256xf32, #tpu.memory_space<vmem>>, %arg7: memref<1xf32, #tpu.memory_space<smem>>, %arg8: memref<1x8xf32, #tpu.memory_space<vmem>>) attributes {dimension_semantics = [#tpu.dimension_semantics<parallel>], iteration_bounds = array<i64: 1>, scalar_prefetch = 0 : i64, scratch_operands = 0 : i64, tpu.core_type = #tpu.core_type<tc>, window_params = [{transform_indices = @transform_0, window_bounds = array<i64: 8, 24>}, {pipeline_mode = #tpu.pipeline_mode<synchronous>, transform_indices = @transform_1, window_bounds = array<i64: 24, 256>}, {pipeline_mode = #tpu.pipeline_mode<synchronous>, transform_indices = @transform_2, window_bounds = array<i64: 1, 256>}, {pipeline_mode = #tpu.pipeline_mode<synchronous>, transform_indices = @transform_3, window_bounds = array<i64: 256, 256>}, {pipeline_mode = #tpu.pipeline_mode<synchronous>, transform_indices = @transform_4, window_bounds = array<i64: 1, 256>}, {pipeline_mode = #tpu.pipeline_mode<synchronous>, transform_indices = @transform_5, window_bounds = array<i64: 1, 256>}, {transform_indices = @transform_6, window_bounds = array<i64: 1>}, {transform_indices = @transform_7, window_bounds = array<i64: 1, 8>}]} {
    %c0 = arith.constant 0 : index
    %c0_0 = arith.constant 0 : index
    %0 = vector.load %arg1[%c0, %c0_0] : memref<8x24xf32, #tpu.memory_space<vmem>>, vector<8x24xf32>
    %1 = arith.truncf %0 : vector<8x24xf32> to vector<8x24xbf16>
    %c0_1 = arith.constant 0 : index
    %c0_2 = arith.constant 0 : index
    %2 = vector.load %arg2[%c0_1, %c0_2] : memref<24x256xbf16, #tpu.memory_space<vmem>>, vector<24x256xbf16>
    %cst = arith.constant dense<0.000000e+00> : vector<8x256xf32>
    %3 = tpu.matmul %1, %2, %cst {dimension_numbers = #tpu.dot_dimension_numbers<[1], [0], [0], [1], [0, 0, 1, 1], [], []>} : vector<8x24xbf16>, vector<24x256xbf16>, vector<8x256xf32> -> vector<8x256xf32>
    %c0_3 = arith.constant 0 : index
    %c0_4 = arith.constant 0 : index
    %4 = vector.load %arg3[%c0_3, %c0_4] : memref<1x256xf32, #tpu.memory_space<vmem>>, vector<1x256xf32>
    %5 = vector.broadcast %4 : vector<1x256xf32> to vector<8x256xf32>
    %6 = arith.addf %3, %5 : vector<8x256xf32>
    %cst_5 = arith.constant 0.000000e+00 : f32
    %7 = vector.broadcast %cst_5 : f32 to vector<8x256xf32>
    %8 = arith.maximumf %6, %7 : vector<8x256xf32>
    %9 = arith.truncf %8 : vector<8x256xf32> to vector<8x256xbf16>
    %c0_6 = arith.constant 0 : index
    %c0_7 = arith.constant 0 : index
    %10 = vector.load %arg4[%c0_6, %c0_7] : memref<256x256xbf16, #tpu.memory_space<vmem>>, vector<256x256xbf16>
    %cst_8 = arith.constant dense<0.000000e+00> : vector<8x256xf32>
    %11 = tpu.matmul %9, %10, %cst_8 {dimension_numbers = #tpu.dot_dimension_numbers<[1], [0], [0], [1], [0, 0, 1, 1], [], []>} : vector<8x256xbf16>, vector<256x256xbf16>, vector<8x256xf32> -> vector<8x256xf32>
    %c0_9 = arith.constant 0 : index
    %c0_10 = arith.constant 0 : index
    %12 = vector.load %arg5[%c0_9, %c0_10] : memref<1x256xf32, #tpu.memory_space<vmem>>, vector<1x256xf32>
    %13 = vector.broadcast %12 : vector<1x256xf32> to vector<8x256xf32>
    %14 = arith.addf %11, %13 : vector<8x256xf32>
    %cst_11 = arith.constant 0.000000e+00 : f32
    %15 = vector.broadcast %cst_11 : f32 to vector<8x256xf32>
    %16 = arith.maximumf %14, %15 : vector<8x256xf32>
    %c0_12 = arith.constant 0 : index
    %c0_13 = arith.constant 0 : index
    %17 = vector.load %arg6[%c0_12, %c0_13] : memref<1x256xf32, #tpu.memory_space<vmem>>, vector<1x256xf32>
    %18 = vector.broadcast %17 : vector<1x256xf32> to vector<8x256xf32>
    %19 = arith.mulf %16, %18 : vector<8x256xf32>
    %cst_14 = arith.constant dense<0.000000e+00> : vector<8xf32>
    %20 = vector.multi_reduction <add>, %19, %cst_14 [1] : vector<8x256xf32> to vector<8xf32>
    %c0_15 = arith.constant 0 : index
    %21 = memref.load %arg7[%c0_15] : memref<1xf32, #tpu.memory_space<smem>>
    %22 = vector.broadcast %21 : f32 to vector<8xf32>
    %23 = arith.addf %20, %22 : vector<8xf32>
    %24 = vector.shape_cast %23 : vector<8xf32> to vector<1x8xf32>
    %c0_16 = arith.constant 0 : index
    %c0_17 = arith.constant 0 : index
    %25 = vector.load %arg8[%c0_16, %c0_17] : memref<1x8xf32, #tpu.memory_space<vmem>>, vector<1x8xf32>
    tpu.vector_store %arg8[%c0_16, %c0_17], %24 {strides = array<i32>} : memref<1x8xf32, #tpu.memory_space<vmem>>, vector<1x8xf32>,
    return
  }
  func.func @transform_0(%arg0: i32) -> (i32, i32) {
    %c0_i32 = arith.constant 0 : i32
    %c0_i32_0 = arith.constant 0 : i32
    return %arg0, %c0_i32 : i32, i32
  }
  func.func @transform_1(%arg0: i32) -> (i32, i32) {
    %c0_i32 = arith.constant 0 : i32
    %c0_i32_0 = arith.constant 0 : i32
    %c0_i32_1 = arith.constant 0 : i32
    return %c0_i32, %c0_i32_0 : i32, i32
  }
  func.func @transform_2(%arg0: i32) -> (i32, i32) {
    %c0_i32 = arith.constant 0 : i32
    %c0_i32_0 = arith.constant 0 : i32
    %c0_i32_1 = arith.constant 0 : i32
    return %c0_i32, %c0_i32_0 : i32, i32
  }
  func.func @transform_3(%arg0: i32) -> (i32, i32) {
    %c0_i32 = arith.constant 0 : i32
    %c0_i32_0 = arith.constant 0 : i32
    %c0_i32_1 = arith.constant 0 : i32
    return %c0_i32, %c0_i32_0 : i32, i32
  }
  func.func @transform_4(%arg0: i32) -> (i32, i32) {
    %c0_i32 = arith.constant 0 : i32
    %c0_i32_0 = arith.constant 0 : i32
    %c0_i32_1 = arith.constant 0 : i32
    return %c0_i32, %c0_i32_0 : i32, i32
  }
  func.func @transform_5(%arg0: i32) -> (i32, i32) {
    %c0_i32 = arith.constant 0 : i32
    %c0_i32_0 = arith.constant 0 : i32
    %c0_i32_1 = arith.constant 0 : i32
    return %c0_i32, %c0_i32_0 : i32, i32
  }
  func.func @transform_6(%arg0: i32) -> i32 {
    %c0_i32 = arith.constant 0 : i32
    %c0_i32_0 = arith.constant 0 : i32
    return %c0_i32 : i32
  }
  func.func @transform_7(%arg0: i32) -> (i32, i32) {
    %c0_i32 = arith.constant 0 : i32
    %c0_i32_0 = arith.constant 0 : i32
    return %c0_i32, %arg0 : i32, i32
  }
}

</mosaic_0001>

<bundles_post_ra>
// kernel: tpu_custom_call.1
= control target key start
LH: loop header
LB: loop body
LE: loop exit
PB: predicated region body
PF: predicated region fallthrough
CT: control target
= control target key end

     0   :  { %13 = vsyncpa [#allocation4], 0  ;;  %s754_s0 = inlined_call_operand.hbm [shape: f32[8,24], index: 0, kind: input, shape index: {}]   ;;  %s755_s1 = inlined_call_operand.hbm [shape: bf16[24,256], index: 1, kind: input, shape index: {}]   ;;  %s756_s2 = inlined_call_operand.vmem [shape: f32[1,256], index: 2, kind: input, shape index: {}]   ;;  %s757_s3 = inlined_call_operand.hbm [shape: bf16[256,256], index: 3, kind: input, shape index: {}]   ;;  %s758_s4 = inlined_call_operand.vmem [shape: f32[1,256], index: 4, kind: input, shape index: {}]   ;;  %s759_s5 = inlined_call_operand.vmem [shape: f32[1,256], index: 5, kind: input, shape index: {}]   ;;  %s760_s6 = inlined_call_operand.<no memory space> [shape: f32[1], index: 6, kind: input, shape index: {}]   ;;  %s761_s7 = inlined_call_operand.hbm [shape: f32[1,8], index: 7, kind: output, shape index: {}]  }
   0x1   :  { %14 = vsyncpa [#allocation7], 0 }
   0x2   :  { %15 = vsyncpa [#allocation5], 0  ;;  %s641_s24 = smov [#allocation6]   ;;  %s547_s28 = scalar_lea.hbm %s755_s1, 384 }
   0x3   :  { %s31_s25 = sshll.u32 %s641_s24, 4  ;;  %p548_p0 = scmp.ne.s32.totalorder %s755_s1, %s547_s28  ;;  %s32_s25 = int_to_ptr.vmem [resolvable:$true] %s31_s25 }
   0x4   :  { %p551_p1 = scmp.lt.u32.totalorder %s547_s28, %s755_s1 }
   0x6   :  { %p553_p2 = pnand %p551_p1, %p548_p0 }
   0x8   :  { %556 = shalt.err (!%p553_p2)
}
   0x9   :  { %s557_s10 = scalar_lea.vmem %s32_s25, 384  ;;  %p562_p4 = scmp.lt.s32.totalorder %s32_s25, %s32_s25 }
   0xa   :  { %p558_p3 = scmp.ne.s32.totalorder %s32_s25, %s557_s10  ;;  %p563_p5 = scmp.lt.s32.totalorder %s557_s10, %s557_s10 }
   0xc   :  { %p564_p6 = por %p563_p5, %p562_p4 }
   0xe   :  { %p565_p7 = pnand %p564_p6, %p558_p3 }
  0x10   :  { %568 = shalt.err (!%p565_p7)
}
  0x11   :  { %s642_s11 = smov 128   ;;  %s643_s12 = smov 8  }
  0x12   :  { %37 = dma.hbm_to_vmem [thread:$0]  %s755_s1, 384, %s32_s25, [#allocation7], %s642_s11, %s642_s11, %s643_s12  }
  0x13   :  { %s644_s15 = smov [#allocation3]   ;;  %s645_s17 = smov [#allocation8]  }
  0x14   :  { %s22_s16 = sshll.u32 %s644_s15, 4  ;;  %s45_s18 = sshll.u32 %s645_s17, 4  ;;  %s23_s16 = int_to_ptr.vmem [resolvable:$true] %s22_s16  ;;  %s46_s18 = int_to_ptr.vmem [resolvable:$true] %s45_s18 }
  0x15   :  { %s569_s21 = scalar_lea.hbm %s754_s0, 128 }
  0x16   :  { %p570_p8 = scmp.ne.s32.totalorder %s754_s0, %s569_s21  ;;  %p573_p9 = scmp.lt.u32.totalorder %s569_s21, %s754_s0 }
  0x18   :  { %p575_p10 = pnand %p573_p9, %p570_p8 }
  0x1a   :  { %578 = shalt.err (!%p575_p10)
}
  0x1b   :  { %s579_s1 = scalar_lea.vmem %s23_s16, 128  ;;  %p584_p12 = scmp.lt.s32.totalorder %s23_s16, %s23_s16 }
  0x1c   :  { %p580_p11 = scmp.ne.s32.totalorder %s23_s16, %s579_s1  ;;  %p585_p13 = scmp.lt.s32.totalorder %s579_s1, %s579_s1 }
  0x1e   :  { %p586_p0 = por %p585_p13, %p584_p12 }
  0x20   :  { %p587_p1 = pnand %p586_p0, %p580_p11 }
  0x22   :  { %590 = shalt.err (!%p587_p1)
}
  0x23   :  { %25 = dma.hbm_to_vmem [thread:$0]  %s754_s0, 128, %s23_s16, [#allocation4]  }
  0x24   :  { %s591_s30 = scalar_lea.hbm %s757_s3, 4096 }
  0x25   :  { %p592_p2 = scmp.ne.s32.totalorder %s757_s3, %s591_s30  ;;  %p595_p3 = scmp.lt.u32.totalorder %s591_s30, %s757_s3 }
  0x27   :  { %p597_p4 = pnand %p595_p3, %p592_p2 }
  0x29   :  { %600 = shalt.err (!%p597_p4)
}
  0x2a   :  { %s601_s14 = scalar_lea.vmem %s46_s18, 4096  ;;  %p606_p6 = scmp.lt.s32.totalorder %s46_s18, %s46_s18 }
  0x2b   :  { %p602_p5 = scmp.ne.s32.totalorder %s46_s18, %s601_s14  ;;  %p607_p7 = scmp.lt.s32.totalorder %s601_s14, %s601_s14 }
  0x2d   :  { %p608_p8 = por %p607_p7, %p606_p6 }
  0x2f   :  { %p609_p9 = pnand %p608_p8, %p602_p5 }
  0x31   :  { %612 = shalt.err (!%p609_p9)
}
  0x32   :  { %51 = dma.hbm_to_vmem [thread:$0]  %s757_s3, 4096, %s46_s18, [#allocation7], %s642_s11, %s642_s11, %s643_s12  }
  0x33   :  { %635 = dma.done.wait [#allocation4], 128  }
  0x34   :  { %636 = vsyncadd [#allocation4], 4294967168 }
  0x35   :  { %637 = dma.done.wait [#allocation7], 4480  }
  0x36   :  { %638 = vsyncadd [#allocation7], 4294962816  ;;  %v646_v0 = vmov 0   ;;  %v494_v1 = vld [vmem:[#allocation6 + $0x4] ss:$8 sps:$4 sm:$0xff]   ;;  %v72_v3 = vld [vmem:[#allocation6 + $0x10] sm:$0xff]  ;;  %v75_v41 = vlaneseq }
  0x37   :  { %143 = vmatprep.mubr.bf16.mxu0 %v646_v0  ;;  %v496_v2 = vld [vmem:[#allocation6] ss:$8 sps:$4 sm:$0xff]   ;;  %vm104_vm0 = vcmask 1043456   ;;  %v68_v4 = vld [vmem:[#allocation3] sm:$0xff]  ;;  %111 = vmatprep.subr.bf16.mxu0 %v494_v1  ;;  %v452_v5 = vcombine.high %v72_v3, %v72_v3  ;;  %v451_v6 = vcombine.low %v72_v3, %v72_v3  ;;  %v502_v10 = vld [vmem:[#allocation8 + $0x14] ss:$8 sps:$4 sm:$0xff]  }
  0x38   :  { %v499_v7 = vld [vmem:[#allocation8 + $0x4] ss:$8 sps:$4 sm:$0xff]   ;;  %112 = vmatpush1.bf16.msra.mxu0 %v496_v2  ;;  %v501_v8 = vld [vmem:[#allocation8] ss:$8 sps:$4 sm:$0xff]   ;;  %v504_v11 = vld [vmem:[#allocation8 + $0x10] ss:$8 sps:$4 sm:$0xff]   ;;  %v69_v12 = vpack.c.bf16 %v68_v4, %v68_v4 }
  0x39   :  { %453 = vmatprep.subr.msk.bf16.mxu0 %vm104_vm0, %v452_v5  ;;  %v106_v9 = vsel %vm104_vm0, %v451_v6, 0  ;;  %360 = vmatprep.subr.bf16.mxu1 %v499_v7  ;;  %v505_v13 = vld [vmem:[#allocation8 + $0x24] ss:$8 sps:$4 sm:$0xff]   ;;  %vm100_vm1 = vcmask 195584   ;;  %v507_v14 = vld [vmem:[#allocation8 + $0x20] ss:$8 sps:$4 sm:$0xff]  }
  0x3a   :  { %361 = vmatpush1.bf16.msra.mxu1 %v501_v8  ;;  %v508_v15 = vld [vmem:[#allocation8 + $0x34] ss:$8 sps:$4 sm:$0xff]   ;;  %v510_v16 = vld [vmem:[#allocation8 + $0x30] ss:$8 sps:$4 sm:$0xff]   ;;  %v511_v17 = vld [vmem:[#allocation8 + $0x44] ss:$8 sps:$4 sm:$0xff]  }
  0x3b   :  { %362 = vmatprep.subr.bf16.mxu1 %v502_v10  ;;  %v513_v18 = vld [vmem:[#allocation8 + $0x40] ss:$8 sps:$4 sm:$0xff]   ;;  %v514_v19 = vld [vmem:[#allocation8 + $0x54] ss:$8 sps:$4 sm:$0xff]   ;;  %v516_v20 = vld [vmem:[#allocation8 + $0x50] ss:$8 sps:$4 sm:$0xff]  }
  0x3c   :  { %114 = vmatpush1.bf16.msra.mxu0 %v106_v9  ;;  %v517_v21 = vld [vmem:[#allocation8 + $0x64] ss:$8 sps:$4 sm:$0xff]   ;;  %v519_v22 = vld [vmem:[#allocation8 + $0x60] ss:$8 sps:$4 sm:$0xff]   ;;  %v520_v23 = vld [vmem:[#allocation8 + $0x74] ss:$8 sps:$4 sm:$0xff]  }
  0x3d   :  { %v522_v24 = vld [vmem:[#allocation8 + $0x70] ss:$8 sps:$4 sm:$0xff]   ;;  %v523_v25 = vld [vmem:[#allocation8 + $0x84] ss:$8 sps:$4 sm:$0xff]   ;;  %v525_v26 = vld [vmem:[#allocation8 + $0x80] ss:$8 sps:$4 sm:$0xff]  }
  0x3e   :  { %363 = vmatpush1.bf16.msra.mxu1 %v504_v11  ;;  %v526_v27 = vld [vmem:[#allocation8 + $0x94] ss:$8 sps:$4 sm:$0xff]   ;;  %v528_v28 = vld [vmem:[#allocation8 + $0x90] ss:$8 sps:$4 sm:$0xff]   ;;  %v529_v29 = vld [vmem:[#allocation8 + $0xa4] ss:$8 sps:$4 sm:$0xff]  }
  0x3f   :  { %454 = vmatmul.mubr.msk.bf16.vlgmr.msra.gmra.mrb[0].mxu0 %vm100_vm1, %v69_v12  ;;  %364 = vmatprep.subr.bf16.mxu1 %v505_v13  ;;  %v531_v30 = vld [vmem:[#allocation8 + $0xa0] ss:$8 sps:$4 sm:$0xff]   ;;  %v532_v31 = vld [vmem:[#allocation8 + $0xb4] ss:$8 sps:$4 sm:$0xff]   ;;  %v534_v32 = vld [vmem:[#allocation8 + $0xb0] ss:$8 sps:$4 sm:$0xff]   ;;  %v421_v12 = vstv %s760_s6 }
  0x40   :  { %v535_v33 = vld [vmem:[#allocation8 + $0xc4] ss:$8 sps:$4 sm:$0xff]   ;;  %v537_v34 = vld [vmem:[#allocation8 + $0xc0] ss:$8 sps:$4 sm:$0xff]   ;;  %v538_v35 = vld [vmem:[#allocation8 + $0xd4] ss:$8 sps:$4 sm:$0xff]  }
  0x41   :  { %v540_v36 = vld [vmem:[#allocation8 + $0xd0] ss:$8 sps:$4 sm:$0xff]   ;;  %v541_v37 = vld [vmem:[#allocation8 + $0xe4] ss:$8 sps:$4 sm:$0xff]   ;;  %v543_v38 = vld [vmem:[#allocation8 + $0xe0] ss:$8 sps:$4 sm:$0xff]  }
  0x42   :  { %365 = vmatpush1.bf16.msra.mxu1 %v507_v14  ;;  %v544_v39 = vld [vmem:[#allocation8 + $0xf4] ss:$8 sps:$4 sm:$0xff]   ;;  %v546_v40 = vld [vmem:[#allocation8 + $0xf0] ss:$8 sps:$4 sm:$0xff]   ;;  %v76_v42 = vshrl.u32 %v75_v41, 7  ;;  %v425_v11 = vand.u32 127, %v75_v41 }
  0x43   :  { %366 = vmatprep.subr.bf16.mxu1 %v508_v15  ;;  %v73_v44 = vld [vmem:[%s756_s2] sm:$0x3]  ;;  %vm431_vm2 = vcmask 57344  }
  0x44   :  { %v77_v43 = vsub.s32 0, %v76_v42  ;;  %v81_v45 = vsub.s32 1, %v76_v42  ;;  %v188_v58 = vld [vmem:[%s758_s4] sm:$0x3]  ;;  %v428_v13 = vsub.s32 %v425_v11, %v76_v42 }
  0x45   :  { %v403_v61 = vld [vmem:[%s759_s5] sm:$0x3]  ;;  %s647_s5 = smov [#allocation9]  }
  0x46   :  { %367 = vmatpush1.bf16.msra.mxu1 %v510_v16  ;;  %v78_v46 = vrot.slane %v73_v44, %v77_v43  ;;  %v82_v47 = vrot.slane %v73_v44, %v81_v45  ;;  %v193_v59 = vrot.slane %v188_v58, %v77_v43  ;;  %v197_v60 = vrot.slane %v188_v58, %v81_v45  ;;  %s439_s19 = sshll.u32 %s647_s5, 4  ;;  %s440_s19 = int_to_ptr.vmem [resolvable:$true] %s439_s19 }
  0x47   :  { %368 = vmatprep.subr.bf16.mxu1 %v511_v17  ;;  %v408_v1 = vrot.slane %v403_v61, %v77_v43  ;;  %v412_v4 = vrot.slane %v403_v61, %v81_v45  ;;  %s613_s20 = scalar_lea.vmem %s440_s19, 16  ;;  %s617_s21 = scalar_lea.vmem %s440_s19, 32 }
  0x48   :  { %p614_p10 = scmp.ne.s32.totalorder %s440_s19, %s613_s20  ;;  %p618_p11 = scmp.lt.s32.totalorder %s440_s19, %s440_s19 }
  0x49   :  { %p619_p12 = scmp.lt.s32.totalorder %s617_s21, %s613_s20 }
  0x4a   :  { %369 = vmatpush1.bf16.msra.mxu1 %v513_v18 }
  0x4b   :  { %370 = vmatprep.subr.bf16.mxu1 %v514_v19  ;;  %p620_p13 = por %p619_p12, %p618_p11 }
  0x4d   :  { %p621_p0 = pnand %p620_p13, %p614_p10 }
  0x4e   :  { %371 = vmatpush1.bf16.msra.mxu1 %v516_v20 }
  0x4f   :  { %372 = vmatprep.subr.bf16.mxu1 %v517_v21 }
  0x52   :  { %373 = vmatpush1.bf16.msra.mxu1 %v519_v22 }
  0x53   :  { %374 = vmatprep.subr.bf16.mxu1 %v520_v23 }
  0x56   :  { %375 = vmatpush1.bf16.msra.mxu1 %v522_v24 }
  0x57   :  { %376 = vmatprep.subr.bf16.mxu1 %v523_v25 }
  0x5a   :  { %377 = vmatpush1.bf16.msra.mxu1 %v525_v26 }
  0x5b   :  { %378 = vmatprep.subr.bf16.mxu1 %v526_v27 }
  0x5e   :  { %379 = vmatpush1.bf16.msra.mxu1 %v528_v28 }
  0x5f   :  { %380 = vmatprep.subr.bf16.mxu1 %v529_v29 }
  0x62   :  { %381 = vmatpush1.bf16.msra.mxu1 %v531_v30 }
  0x63   :  { %382 = vmatprep.subr.bf16.mxu1 %v532_v31 }
  0x66   :  { %383 = vmatpush1.bf16.msra.mxu1 %v534_v32 }
  0x67   :  { %384 = vmatprep.subr.bf16.mxu1 %v535_v33 }
  0x6a   :  { %385 = vmatpush1.bf16.msra.mxu1 %v537_v34 }
  0x6b   :  { %386 = vmatprep.subr.bf16.mxu1 %v538_v35 }
  0x6e   :  { %387 = vmatpush1.bf16.msra.mxu1 %v540_v36 }
  0x6f   :  { %388 = vmatprep.subr.bf16.mxu1 %v541_v37 }
  0x72   :  { %389 = vmatpush1.bf16.msra.mxu1 %v543_v38 }
  0x73   :  { %390 = vmatprep.subr.bf16.mxu1 %v544_v39 }
  0x76   :  { %391 = vmatpush1.bf16.msra.mxu1 %v546_v40 }
 0x112   :  { %v145_v48 = vpop.f32.mrb[0].mxu0 }
 0x113   :  { %v146_v49 = vadd.f32 %v145_v48, %v78_v46  ;;  %v147_v50 = vpop.f32.mrb[1].mxu0 }
 0x114   :  { %v148_v51 = vadd.f32 %v147_v50, %v82_v47  ;;  %v149_v52 = vpop.f32.mrb[2].mxu0 }
 0x115   :  { %v152_v53 = vmax.f32 %v146_v49, 0.0  ;;  %v150_v54 = vpop.f32.mrb[3].mxu0 }
 0x116   :  { %v153_v55 = vmax.f32 %v148_v51, 0.0 }
 0x117   :  { %v154_v57 = vpack.c.bf16 %v152_v53, %v152_v53 }
 0x118   :  { %v155_v56 = vpack.c.bf16 %v153_v55, %v153_v55 }
 0x11a   :  { %392 = vmatprep.mubr.bf16.mxu1 %v155_v56 }
 0x11b   :  { %393 = vmatmul.mubr.bf16.vlgmr.msra.gmra.mrb[0].mxu1 %v154_v57 }
 0x1ee   :  { %v394_v62 = vpop.f32.mrb[0].mxu1 }
 0x1ef   :  { %v395_v63 = vadd.f32 %v394_v62, %v193_v59  ;;  %v396_v0 = vpop.f32.mrb[1].mxu1 }
 0x1f0   :  { %v397_v2 = vadd.f32 %v396_v0, %v197_v60  ;;  %v398_v3 = vpop.f32.mrb[2].mxu1 }
 0x1f1   :  { %v401_v5 = vmax.f32 %v395_v63, 0.0  ;;  %v399_v6 = vpop.f32.mrb[3].mxu1 }
 0x1f2   :  { %v402_v7 = vmax.f32 %v397_v2, 0.0 }
 0x1f3   :  { %v415_v8 = vmul.f32 %v408_v1, %v401_v5 }
 0x1f4   :  { %v416_v9 = vmul.f32 %v412_v4, %v402_v7 }
 0x1f6   :  { %v417_v10 = vadd.f32 %v416_v9, %v415_v8 }
 0x1f8   :  { %418 = vadd.xlane.f32.xlu0 %v417_v10 }
 0x285   :  { %v419_v14 = vpop.xlane.xlu0 %418 }
 0x286   :  { %v422_v15 = vadd.f32 %v421_v12, %v419_v14 }
 0x288   :  { %v429_v16 = vrot.slane %v422_v15, %v428_v13 }
 0x28a   :  { %432 = vst.msk [vmem:[#allocation9] sm:$0x1] %vm431_vm2, %v429_v16 }
 0x28b   :  { %624 = shalt.err (!%p621_p0)
}
 0x28c   :  { %s625_s6 = scalar_lea.hbm %s761_s7, 16 }
 0x28d   :  { %p626_p1 = scmp.ne.s32.totalorder %s761_s7, %s625_s6  ;;  %p629_p2 = scmp.lt.u32.totalorder %s625_s6, %s761_s7 }
 0x28f   :  { %p631_p3 = pnand %p629_p2, %p626_p1 }
 0x291   :  { %634 = shalt.err (!%p631_p3)
}
 0x292   :  { %442 = dma.vmem_to_hbm [thread:$0]  %s440_s19, 16, %s761_s7, [#allocation5]  }
 0x293   :  { %639 = dma.done.wait [#allocation5], 16  }
 0x294   :  { %640 = vsyncadd [#allocation5], 4294967280 }
 0x295   :  { %446 = vsyncpa [#allocation4], 1 }
 0x296   :  { %447 = vsyncpa [#allocation7], 1 }
 0x297   :  { %448 = vsyncpa [#allocation5], 1 }

</bundles_post_ra>
